<compile_context>
chip_gen: v5e
topology: v5e:2x2
jax: 0.10.0
libtpu: 0.0.40
codegen_flags: <defaults>
</compile_context>

<pallas_src>
import numpy as np
import jax
import jax.numpy as jnp
from jax.experimental import pallas as pl
from jax.experimental.pallas import tpu as pltpu


# ---------------------------------------------------------------------------
# Operator-matrix construction (host-side numpy glue)
# ---------------------------------------------------------------------------
def _adaptive_pool_matrix(in_size, out_size):
    """Row-stochastic matrix M (out, in) implementing AdaptiveAvgPool1d."""
    M = np.zeros((out_size, in_size), dtype=np.float32)
    for i in range(out_size):
        start = (i * in_size) // out_size
        end = -(-((i + 1) * in_size) // out_size)  # ceil
        M[i, start:end] = 1.0 / (end - start)
    return M


def _bilinear_matrix(out_size, in_size):
    """Matrix M (out, in): bilinear upsample, align_corners=False (PyTorch)."""
    M = np.zeros((out_size, in_size), dtype=np.float32)
    scale = in_size / out_size
    for o in range(out_size):
        src = (o + 0.5) * scale - 0.5
        if src < 0.0:
            src = 0.0
        i0 = min(int(np.floor(src)), in_size - 1)
        lam = src - i0
        i1 = min(i0 + 1, in_size - 1)
        M[o, i0] += 1.0 - lam
        M[o, i1] += lam
    return M


def init_params(key, in_channels, out_channels, pool_size):
    """Synthetic PSPBlock params: 1x1 conv weight + folded BN (eval) or bias."""
    use_batchnorm = pool_size != 1  # PSPBlock forces BN off when pool_size == 1
    k0, k1, k2, k3, k4 = jax.random.split(key, 5)
    w = jax.random.normal(k0, (out_channels, in_channels), jnp.float32) * (
        1.0 / np.sqrt(in_channels)
    )
    if use_batchnorm:
        gamma = 1.0 + 0.1 * jax.random.normal(k1, (out_channels,), jnp.float32)
        beta = 0.1 * jax.random.normal(k2, (out_channels,), jnp.float32)
        mean = 0.05 * jax.random.normal(k3, (out_channels,), jnp.float32)
        var = 1.0 + 0.1 * jax.random.uniform(k4, (out_channels,), jnp.float32)
        eps = 1e-5
        scale = gamma / jnp.sqrt(var + eps)   # folded BatchNorm (eval mode)
        bias = beta - mean * scale
    else:
        scale = jnp.ones((out_channels,), jnp.float32)
        bias = 0.1 * jax.random.normal(k2, (out_channels,), jnp.float32)  # conv bias
    return {"weight": w, "scale": scale, "bias": bias}


# ---------------------------------------------------------------------------
# Pallas kernel: one batch item per grid step, whole block fused
# ---------------------------------------------------------------------------
def _psp_block_kernel(x_ref, poolT_ref, w_ref, bias_ref, upT_ref, o_ref):
    cdt = w_ref.dtype                      # compute dtype (f32 or bf16)
    x = x_ref[0]                           # (C_in, HW)

    # Adaptive average pool: one matmul against the pooling operator.
    pooled = jnp.dot(x, poolT_ref[...],
                     preferred_element_type=jnp.float32)      # (C_in, s2) f32

    # 1x1 conv with BN scale pre-folded into the weight; bias added in f32.
    z = jnp.dot(w_ref[...], pooled.astype(cdt),
                preferred_element_type=jnp.float32)           # (C_out, s2) f32
    z = jnp.maximum(z + bias_ref[...], 0.0)                   # ReLU

    # Bilinear upsample back to (H, W): one matmul against the upsample
    # operator; output store is lane-dense (HW last, multiple of 128).
    o_ref[0] = jnp.dot(z.astype(cdt), upT_ref[...],
                       preferred_element_type=jnp.float32).astype(o_ref.dtype)


def psp_block(x, params, pool_size, compute_dtype=jnp.float32):
    """x: (N, C_in, H, W) float32 -> (N, C_out, H, W)."""
    N, C_in, H, W = x.shape
    C_out = params["weight"].shape[0]
    HW = H * W
    s2 = pool_size * pool_size

    # Precompute separable pool / upsample operators (Kronecker products).
    Py = _adaptive_pool_matrix(H, pool_size)   # (s, H)
    Px = _adaptive_pool_matrix(W, pool_size)   # (s, W)
    Uy = _bilinear_matrix(H, pool_size)        # (H, s)
    Ux = _bilinear_matrix(W, pool_size)        # (W, s)
    poolT = np.kron(Py, Px).T                  # (HW, s2)
    upT = np.kron(Uy, Ux).T                    # (s2, HW)

    # Fold the (eval-mode) BatchNorm scale into the 1x1 conv weight.
    w_eff = (params["weight"] * params["scale"][:, None]).astype(compute_dtype)
    bias = params["bias"][:, None].astype(jnp.float32)        # (C_out, 1)

    x_flat = x.reshape(N, C_in, HW).astype(compute_dtype)
    poolT_j = jnp.asarray(poolT).astype(compute_dtype)
    upT_j = jnp.asarray(upT).astype(compute_dtype)

    out = pl.pallas_call(
        _psp_block_kernel,
        out_shape=jax.ShapeDtypeStruct((N, C_out, HW), x.dtype),
        grid_spec=pltpu.PrefetchScalarGridSpec(
            num_scalar_prefetch=0,
            grid=(N,),                                        # batch only
            in_specs=[
                pl.BlockSpec((1, C_in, HW), lambda n: (n, 0, 0)),
                # Operators / params: constant block index across the grid,
                # fetched once and kept resident in VMEM.
                pl.BlockSpec((HW, s2), lambda n: (0, 0)),
                pl.BlockSpec((C_out, C_in), lambda n: (0, 0)),
                pl.BlockSpec((C_out, 1), lambda n: (0, 0)),
                pl.BlockSpec((s2, HW), lambda n: (0, 0)),
            ],
            out_specs=pl.BlockSpec((1, C_out, HW), lambda n: (n, 0, 0)),
        ),
        compiler_params=pltpu.CompilerParams(
            dimension_semantics=("parallel",),  # batch items are independent
        ),
    )(x_flat, poolT_j, w_eff, bias, upT_j)

    return out.reshape(N, C_out, H, W)


# ---------------------------------------------------------------------------
# Pure-jnp reference (PyTorch PSPBlock semantics, unfolded BN) for validation
# ---------------------------------------------------------------------------
def psp_block_reference(x, params, pool_size):
    N, C_in, H, W = x.shape
    Py = jnp.asarray(_adaptive_pool_matrix(H, pool_size))
    Px = jnp.asarray(_adaptive_pool_matrix(W, pool_size))
    Uy = jnp.asarray(_bilinear_matrix(H, pool_size))
    Ux = jnp.asarray(_bilinear_matrix(W, pool_size))
    pooled = jnp.einsum("iy,jx,ncyx->ncij", Py, Px, x)            # adaptive pool
    z = jnp.einsum("oc,ncij->noij", params["weight"], pooled)     # 1x1 conv
    z = z * params["scale"][None, :, None, None] \
        + params["bias"][None, :, None, None]                     # BN (eval) / bias
    z = jnp.maximum(z, 0.0)                                       # ReLU
    return jnp.einsum("Yi,Xj,noij->noYX", Uy, Ux, z)              # bilinear up


if __name__ == "__main__":
    key = jax.random.PRNGKey(0)
    kx, kp = jax.random.split(key)

    N, C_in, H, W = 2, 4, 16, 16
    C_out = 8

    x = jax.random.normal(kx, (N, C_in, H, W), jnp.float32)

    # Exercise the PSP pyramid's pool sizes (1 disables BN, as in PSPBlock).
    for pool_size in (1, 2, 3, 6):
        params = init_params(kp, C_in, C_out, pool_size)
        ref = psp_block_reference(x, params, pool_size)

        # f32 compute path: exact check against the reference.
        out_f32 = jax.block_until_ready(
            psp_block(x, params, pool_size, compute_dtype=jnp.float32)
        )
        assert out_f32.shape == (N, C_out, H, W), out_f32.shape
        np.testing.assert_allclose(np.asarray(out_f32), np.asarray(ref),
                                   rtol=1e-5, atol=1e-5)

    # Reduced-precision (bf16 operands, f32 accumulation) path on one config.
    params = init_params(kp, C_in, C_out, 6)
    ref = psp_block_reference(x, params, 6)
    out_bf16 = jax.block_until_ready(
        psp_block(x, params, 6, compute_dtype=jnp.bfloat16)
    )
    np.testing.assert_allclose(np.asarray(out_bf16), np.asarray(ref),
                               rtol=2e-2, atol=2e-2)

    print("KERNEL_OK")
</pallas_src>

<mosaic_0001>
module attributes {stable_mosaic.version = 11 : i64} {
  func.func @_psp_block_kernel(%arg0: i32, %arg1: memref<1x4x256xf32, #tpu.memory_space<vmem>>, %arg2: memref<256x1xf32, #tpu.memory_space<vmem>>, %arg3: memref<8x4xf32, #tpu.memory_space<vmem>>, %arg4: memref<8x1xf32, #tpu.memory_space<vmem>>, %arg5: memref<1x256xf32, #tpu.memory_space<vmem>>, %arg6: memref<1x8x256xf32, #tpu.memory_space<vmem>>) attributes {dimension_semantics = [#tpu.dimension_semantics<parallel>], iteration_bounds = array<i64: 2>, scalar_prefetch = 0 : i64, scratch_operands = 0 : i64, tpu.core_type = #tpu.core_type<tc>, window_params = [{transform_indices = @transform_0, window_bounds = array<i64: 1, 4, 256>}, {pipeline_mode = #tpu.pipeline_mode<synchronous>, transform_indices = @transform_1, window_bounds = array<i64: 256, 1>}, {pipeline_mode = #tpu.pipeline_mode<synchronous>, transform_indices = @transform_2, window_bounds = array<i64: 8, 4>}, {pipeline_mode = #tpu.pipeline_mode<synchronous>, transform_indices = @transform_3, window_bounds = array<i64: 8, 1>}, {pipeline_mode = #tpu.pipeline_mode<synchronous>, transform_indices = @transform_4, window_bounds = array<i64: 1, 256>}, {transform_indices = @transform_5, window_bounds = array<i64: 1, 8, 256>}]} {
    %c0 = arith.constant 0 : index
    %c0_0 = arith.constant 0 : index
    %c0_1 = arith.constant 0 : index
    %0 = vector.load %arg1[%c0, %c0_0, %c0_1] : memref<1x4x256xf32, #tpu.memory_space<vmem>>, vector<1x4x256xf32>
    %1 = vector.shape_cast %0 : vector<1x4x256xf32> to vector<4x256xf32>
    %c0_2 = arith.constant 0 : index
    %c0_3 = arith.constant 0 : index
    %2 = vector.load %arg2[%c0_2, %c0_3] : memref<256x1xf32, #tpu.memory_space<vmem>>, vector<256x1xf32>
    %cst = arith.constant dense<0.000000e+00> : vector<4x1xf32>
    %3 = tpu.matmul %1, %2, %cst {dimension_numbers = #tpu.dot_dimension_numbers<[1], [0], [0], [1], [0, 0, 1, 1], [], []>} : vector<4x256xf32>, vector<256x1xf32>, vector<4x1xf32> -> vector<4x1xf32>
    %c0_4 = arith.constant 0 : index
    %c0_5 = arith.constant 0 : index
    %4 = vector.load %arg3[%c0_4, %c0_5] : memref<8x4xf32, #tpu.memory_space<vmem>>, vector<8x4xf32>
    %cst_6 = arith.constant dense<0.000000e+00> : vector<8x1xf32>
    %5 = tpu.matmul %4, %3, %cst_6 {dimension_numbers = #tpu.dot_dimension_numbers<[1], [0], [0], [1], [0, 0, 1, 1], [], []>} : vector<8x4xf32>, vector<4x1xf32>, vector<8x1xf32> -> vector<8x1xf32>
    %c0_7 = arith.constant 0 : index
    %c0_8 = arith.constant 0 : index
    %6 = vector.load %arg4[%c0_7, %c0_8] : memref<8x1xf32, #tpu.memory_space<vmem>>, vector<8x1xf32>
    %7 = arith.addf %5, %6 : vector<8x1xf32>
    %cst_9 = arith.constant 0.000000e+00 : f32
    %8 = vector.broadcast %cst_9 : f32 to vector<8x1xf32>
    %9 = arith.maximumf %7, %8 : vector<8x1xf32>
    %c0_10 = arith.constant 0 : index
    %c0_11 = arith.constant 0 : index
    %10 = vector.load %arg5[%c0_10, %c0_11] : memref<1x256xf32, #tpu.memory_space<vmem>>, vector<1x256xf32>
    %cst_12 = arith.constant dense<0.000000e+00> : vector<8x256xf32>
    %11 = tpu.matmul %9, %10, %cst_12 {dimension_numbers = #tpu.dot_dimension_numbers<[1], [0], [0], [1], [0, 0, 1, 1], [], []>} : vector<8x1xf32>, vector<1x256xf32>, vector<8x256xf32> -> vector<8x256xf32>
    %c0_13 = arith.constant 0 : index
    %c0_14 = arith.constant 0 : index
    %c0_15 = arith.constant 0 : index
    %12 = vector.load %arg6[%c0_13, %c0_14, %c0_15] : memref<1x8x256xf32, #tpu.memory_space<vmem>>, vector<1x8x256xf32>
    %13 = vector.shape_cast %12 : vector<1x8x256xf32> to vector<8x256xf32>
    %14 = vector.shape_cast %11 : vector<8x256xf32> to vector<1x8x256xf32>
    tpu.vector_store %arg6[%c0_13, %c0_14, %c0_15], %14 {strides = array<i32>} : memref<1x8x256xf32, #tpu.memory_space<vmem>>, vector<1x8x256xf32>,
    return
  }
  func.func @transform_0(%arg0: i32) -> (i32, i32, i32) {
    %c0_i32 = arith.constant 0 : i32
    %c0_i32_0 = arith.constant 0 : i32
    %c0_i32_1 = arith.constant 0 : i32
    return %arg0, %c0_i32, %c0_i32_0 : i32, i32, i32
  }
  func.func @transform_1(%arg0: i32) -> (i32, i32) {
    %c0_i32 = arith.constant 0 : i32
    %c0_i32_0 = arith.constant 0 : i32
    %c0_i32_1 = arith.constant 0 : i32
    return %c0_i32, %c0_i32_0 : i32, i32
  }
  func.func @transform_2(%arg0: i32) -> (i32, i32) {
    %c0_i32 = arith.constant 0 : i32
    %c0_i32_0 = arith.constant 0 : i32
    %c0_i32_1 = arith.constant 0 : i32
    return %c0_i32, %c0_i32_0 : i32, i32
  }
  func.func @transform_3(%arg0: i32) -> (i32, i32) {
    %c0_i32 = arith.constant 0 : i32
    %c0_i32_0 = arith.constant 0 : i32
    %c0_i32_1 = arith.constant 0 : i32
    return %c0_i32, %c0_i32_0 : i32, i32
  }
  func.func @transform_4(%arg0: i32) -> (i32, i32) {
    %c0_i32 = arith.constant 0 : i32
    %c0_i32_0 = arith.constant 0 : i32
    %c0_i32_1 = arith.constant 0 : i32
    return %c0_i32, %c0_i32_0 : i32, i32
  }
  func.func @transform_5(%arg0: i32) -> (i32, i32, i32) {
    %c0_i32 = arith.constant 0 : i32
    %c0_i32_0 = arith.constant 0 : i32
    %c0_i32_1 = arith.constant 0 : i32
    return %arg0, %c0_i32, %c0_i32_0 : i32, i32, i32
  }
}

</mosaic_0001>

<bundles_post_ra>
// kernel: tpu_custom_call.1
= control target key start
LH: loop header
LB: loop body
LE: loop exit
PB: predicated region body
PF: predicated region fallthrough
CT: control target
= control target key end

     0   :  { %10 = vsyncpa [#allocation3], 0  ;;  %s807_s0 = inlined_call_operand.vmem [shape: f32[2,4,256], index: 0, kind: input, shape index: {}]   ;;  %s808_s1 = inlined_call_operand.vmem [shape: f32[256,1], index: 1, kind: input, shape index: {}]   ;;  %s809_s2 = inlined_call_operand.vmem [shape: f32[8,4], index: 2, kind: input, shape index: {}]   ;;  %s810_s3 = inlined_call_operand.vmem [shape: f32[8,1], index: 3, kind: input, shape index: {}]   ;;  %s811_s4 = inlined_call_operand.vmem [shape: f32[1,256], index: 4, kind: input, shape index: {}]   ;;  %s812_s5 = inlined_call_operand.hbm [shape: f32[2,8,256], index: 5, kind: output, shape index: {}]  }
   0x1   :  { %12 = vsyncpa [#allocation3 + $0x1], 0  ;;  %s617_s18 = smov 0   ;;  %s619_s19 = smov 0  }
   0x2   :  { %s621_s20 = smov 0   ;;  %s623_s21 = smov 0  }
   0x3 LB: > { %s638_s22 = sadd.s32 4294967295, %s585_s21   ;;  %s464_s23 = sadd.s32 4294967294, %s585_s21   ;;  %s585_s21 = sphi %s623_s21, %s818_s21   ;;  %s581_s20 = sphi %s621_s20, %s817_s20   ;;  %s577_s19 = sphi %s619_s19, %s816_s19   ;;  %s573_s18 = sphi %s617_s18, %s815_s18  }
   0x4   : > { %s642_s24 = sadd.s32 1, %s585_s21   ;;  %s135_s25 = sadd.s32 1, %s581_s20 }
   0x5   : > { %s132_s26 = ssub.s32 %s585_s21, %s642_s24  ;;  %p145_p0 = scmp.ne.s32.totalorder %s581_s20, %s577_s19 }
   0x6   : > { %p133_p1 = scmp.eq.s32.totalorder %s132_s26, 0  ;;  %p146_p2 = scmp.eq.s32.totalorder %s638_s22, 1 }
   0x7   : > { %p151_p3 = scmp.ne.s32.totalorder %s577_s19, %s573_s18  ;;  %p152_p4 = scmp.eq.s32.totalorder %s464_s23, 1 }
   0x8   : > { %s653_s27 = scalar_select %p133_p1, %s581_s20, %s135_s25  }
   0x9   : > { %p655_p5 = por %p146_p2, %p145_p0  ;;  %p659_p6 = por %p152_p4, %p151_p3 }
   0xa   : > { %p467_p7 = scmp.ge.s32.totalorder %s585_s21, 1  ;;  %p190_p8 = scmp.lt.s32.totalorder %s585_s21, 3 }
   0xc   : > { %p191_p9 = pnand %p467_p7, %p190_p8 }
   0xd   : > { %p218_p10 = scmp.lt.s32.totalorder (!%p191_p9), %s638_s22, 1  ;;  %s215_s16 = sand.u32 (!%p191_p9), 1, %s577_s19  }
   0xe   : > { %194 = sbr.rel (%p191_p9) target bundleno = 453 (0x1c5), region = 40  ;;  %s483_s23 = sshll.u32 (!%p191_p9), %s638_s22, 4 }
   0xf   : > { %s400_s30 = scalar_lea.hbm (!%p191_p9), %s812_s5, %s483_s23  ;;  %s389_s9 = scalar_lea.sflag (!%p191_p9), [#allocation3], %s215_s16 }
  0x10   : > { %s404_s8 = sshll.u32 (!%p191_p9), %s400_s30, 4  ;;  %s543_s14 = scalar_lea.hbm (!%p191_p9), %s812_s5, 32  ;;  %s405_s8 = int_to_ptr.hbm [resolvable:$true] %s404_s8 }
  0x11   : > { %s537_s10 = sshra.s32 (!%p191_p9), %s405_s8, 4  ;;  %s538_s10 = int_to_ptr.hbm [resolvable:$true] %s537_s10 }
  0x12   : > { %s539_s11 = scalar_lea.hbm (!%p191_p9), %s538_s10, 16  ;;  %p544_p0 = scmp.lt.s32.totalorder (!%p191_p9), %s538_s10, %s812_s5 }
  0x13   : > { %v239_v0 = vld [vmem:[%s808_s1 + $0x78] sm:$0xff]  ;;  %v238_v2 = vld [vmem:[%s808_s1 + $0x70] sm:$0xff]  ;;  %v237_v4 = vld [vmem:[%s808_s1 + $0x68] sm:$0xff]  ;;  %s219_s17 = scalar_select %p218_p10, %s638_s22, 1  ;;  %vm308_vm0 = vcmask 1043456   ;;  %vm304_vm1 = vcmask 31744  }
  0x14   : > { %v255_v1 = vld [vmem:[%s808_s1 + $0xf8] sm:$0xff]  ;;  %262 = vmatpush.msra.mxu0 %v239_v0  ;;  %v254_v3 = vld [vmem:[%s808_s1 + $0xf0] sm:$0xff]  ;;  %v253_v5 = vld [vmem:[%s808_s1 + $0xe8] sm:$0xff]  ;;  %vm341_vm2 = vcmask 1040384   ;;  %vm337_vm3 = vcmask 7168   ;;  %p540_p11 = scmp.ne.s32.totalorder %s538_s10, %s539_s11  ;;  %p545_p1 = scmp.lt.s32.totalorder %s543_s14, %s539_s11 }
  0x15   : > { %282 = vmatpush.msra.mxu1 %v255_v1  ;;  %v236_v6 = vld [vmem:[%s808_s1 + $0x60] sm:$0xff]  ;;  %s482_s6 = sshll.u32 %s219_s17, 3  ;;  %v235_v8 = vld [vmem:[%s808_s1 + $0x58] sm:$0xff]  ;;  %v234_v10 = vld [vmem:[%s808_s1 + $0x50] sm:$0xff]  ;;  %s468_s17 = sshll.u32 %s215_s16, 4 }
  0x16   : > { %263 = vmatpush.msra.mxu0 %v238_v2  ;;  %v252_v7 = vld [vmem:[%s808_s1 + $0xe0] sm:$0xff]  ;;  %v251_v9 = vld [vmem:[%s808_s1 + $0xd8] sm:$0xff]  ;;  %s222_s13 = scalar_lea.vmem %s807_s0, %s482_s6  ;;  %v250_v11 = vld [vmem:[%s808_s1 + $0xd0] sm:$0xff]  ;;  %s217_s6 = scalar_lea.vmem [#allocation2], %s468_s17 }
  0x17   : > { %283 = vmatpush.msra.mxu1 %v254_v3  ;;  %v233_v12 = vld [vmem:[%s808_s1 + $0x48] sm:$0xff]  ;;  %v223_v14 = vld [vmem:[%s222_s13] sm:$0xff]  ;;  %v231_v17 = vld [vmem:[%s808_s1 + $0x38] sm:$0xff]  ;;  %s402_s7 = sshll.u32 %s217_s6, 4  ;;  %p541_p12 = pnand %p540_p11, %p655_p5  ;;  %s403_s7 = int_to_ptr.vmem [resolvable:$true] %s402_s7 }
  0x18   : > { %264 = vmatpush.msra.mxu0 %v237_v4  ;;  %v249_v13 = vld [vmem:[%s808_s1 + $0xc8] sm:$0xff]  ;;  %257 = vst [vmem:[#allocation1] ss:$2 sm:$0xff] %v223_v14  ;;  %v232_v15 = vld [vmem:[%s808_s1 + $0x40] sm:$0xff]  ;;  %v247_v18 = vld [vmem:[%s808_s1 + $0xb8] sm:$0xff]  ;;  %p546_p2 = por %p545_p1, %p544_p0 }
  0x19   : > { %284 = vmatpush.msra.mxu1 %v253_v5  ;;  %v248_v16 = vld [vmem:[%s808_s1 + $0xc0] sm:$0xff]  ;;  %v230_v19 = vld [vmem:[%s808_s1 + $0x30] sm:$0xff]  ;;  %v229_v21 = vld [vmem:[%s808_s1 + $0x28] sm:$0xff]  ;;  %p542_p13 = pneg %p541_p12 }
  0x1a   : > { %265 = vmatpush.msra.mxu0 %v236_v6  ;;  %v246_v20 = vld [vmem:[%s808_s1 + $0xb0] sm:$0xff]  ;;  %v245_v22 = vld [vmem:[%s808_s1 + $0xa8] sm:$0xff]  ;;  %v228_v23 = vld [vmem:[%s808_s1 + $0x20] sm:$0xff] }
  0x1b   : > { %285 = vmatpush.msra.mxu1 %v252_v7  ;;  %v244_v24 = vld [vmem:[%s808_s1 + $0xa0] sm:$0xff]  ;;  %v227_v25 = vld [vmem:[%s808_s1 + $0x18] sm:$0xff]  ;;  %v226_v27 = vld [vmem:[%s808_s1 + $0x10] sm:$0xff]  ;;  %p547_p3 = pnand %p546_p2, %p542_p13 }
  0x1c   : > { %266 = vmatpush.msra.mxu0 %v235_v8  ;;  %v243_v26 = vld [vmem:[%s808_s1 + $0x98] sm:$0xff]  ;;  %v242_v28 = vld [vmem:[%s808_s1 + $0x90] sm:$0xff]  ;;  %v225_v29 = vld [vmem:[%s808_s1 + $0x8] sm:$0xff] }
  0x1d   : > { %286 = vmatpush.msra.mxu1 %v251_v9  ;;  %v241_v30 = vld [vmem:[%s808_s1 + $0x88] sm:$0xff]  ;;  %v224_v31 = vld [vmem:[%s808_s1] sm:$0xff] }
  0x1e   : > { %267 = vmatpush.msra.mxu0 %v234_v10  ;;  %v240_v32 = vld [vmem:[%s808_s1 + $0x80] sm:$0xff] }
  0x1f   : > { %287 = vmatpush.msra.mxu1 %v250_v11  ;;  %v258_v33 = vld.sshfl [vmem:[#allocation1] sm:$0xff pattern:$0x75316420]  ;;  %v259_v34 = vld.sshfl [vmem:[#allocation1 + $0x8] sm:$0xff pattern:$0x75316420] }
  0x20   : > { %268 = vmatpush.msra.mxu0 %v233_v12  ;;  %v333_v35 = vld [vmem:[%s811_s4] sm:$0x3] }
  0x21   : > { %288 = vmatpush.msra.mxu1 %v249_v13  ;;  %v302_v39 = vld [vmem:[%s809_s2] sm:$0xff]  ;;  %v336_v40 = vperm.slane %v333_v35, 1  ;;  %v335_v41 = vperm.slane %v333_v35, 0 }
  0x22   : > { %269 = vmatpush.msra.mxu0 %v232_v15  ;;  %v303_v42 = vld [vmem:[%s810_s3] sm:$0xff] }
  0x23   : > { %289 = vmatpush.msra.mxu1 %v248_v16  ;;  %473 = vmatpush.msk.msra.mxu3 %vm341_vm2, %v335_v41 }
  0x24   : > { %270 = vmatpush.msra.mxu0 %v231_v17 }
  0x25   : > { %290 = vmatpush.msra.mxu1 %v247_v18 }
  0x26   : > { %271 = vmatpush.msra.mxu0 %v230_v19 }
  0x27   : > { %291 = vmatpush.msra.mxu1 %v246_v20 }
  0x28   : > { %272 = vmatpush.msra.mxu0 %v229_v21 }
  0x29   : > { %292 = vmatpush.msra.mxu1 %v245_v22 }
  0x2a   : > { %273 = vmatpush.msra.mxu0 %v228_v23 }
  0x2b   : > { %293 = vmatpush.msra.mxu1 %v244_v24 }
  0x2c   : > { %274 = vmatpush.msra.mxu0 %v227_v25 }
  0x2d   : > { %294 = vmatpush.msra.mxu1 %v243_v26 }
  0x2e   : > { %275 = vmatpush.msra.mxu0 %v226_v27 }
  0x2f   : > { %295 = vmatpush.msra.mxu1 %v242_v28 }
  0x30   : > { %276 = vmatpush.msra.mxu0 %v225_v29 }
  0x31   : > { %296 = vmatpush.msra.mxu1 %v241_v30 }
  0x32   : > { %277 = vmatpush.msra.mxu0 %v224_v31 }
  0x33   : > { %297 = vmatpush.msra.mxu1 %v240_v32  ;;  %278 = vmatmul.f32.vlgmr.msra.gmra.mxu0 %v258_v33 }
  0x34   : > { %298 = vmatmul.f32.vlgmr.msra.gmra.mxu1 %v259_v34 }
  0xb0   : > { %v279_v36 = vpop.f32.mrf.mxu0 }
  0xb1   : > { %v299_v37 = vpop.f32.mrf.mxu1 }
  0xb2   : > { %v300_v38 = vadd.f32 %v299_v37, %v279_v36 }
  0xb4   : > { %471 = vmatpush.msk.msra.mxu2 %vm308_vm0, %v300_v38 }
  0xb5   : > { %472 = vmatmul.msk.f32.vlgmr.msra.gmra.mxu2 %vm304_vm1, %v302_v39 }
  0xb6   : > { %475 = vmatpush.msk.msrb.mxu2 %vm341_vm2, %v336_v40 }
 0x138   : > { %v329_v43 = vpop.f32.mrf.mxu2 }
 0x139   : > { %v330_v44 = vadd.f32 %v329_v43, %v303_v42 }
 0x13b   : > { %v332_v45 = vmax.f32 %v330_v44, 0.0 }
 0x13d   : > { %474 = vmatmul.msk.f32.vlgmr.msra.gmra.mxu3 %vm337_vm3, %v332_v45  ;;  %476 = vmatmul.msk.f32.vlgmr.msrb.gmra.mxu2 %vm337_vm3, %v332_v45 }
 0x1c0   : > { %v363_v46 = vpop.f32.mrf.mxu3  ;;  %v383_v47 = vpop.f32.mrf.mxu2 }
 0x1c1   : > { %386 = vst [vmem:[%s217_s6] sm:$0xff] %v363_v46 }
 0x1c2   : > { %387 = vst [vmem:[%s217_s6 + $0x8] sm:$0xff] %v383_v47 }
 0x1c3   : > { %550 = shalt.err (!%p547_p3)
}
 0x1c4   : > { %484 = dma.vmem_to_hbm [thread:$0]  (%p655_p5), %s403_s7, 256, %s405_s8, %s389_s9  }
 0x1c5 PF: > { %p490_p4 = scmp.ge.s32.totalorder %s585_s21, 2  ;;  %s416_s16 = sand.u32 1, %s573_s18  }
 0x1c6   : > { %s417_s17 = scalar_lea.sflag [#allocation3], %s416_s16 }
 0x1c7   : > { %p487_p7 = pnand %p490_p4, %p659_p6 }
 0x1c9   : > { %p488_p8 = pneg %p487_p7 }
 0x1cb   : > { %568 = dma.done.wait (%p488_p8), %s417_s17, 256  }
 0x1cc   : > { %570 = vsyncadd (%p488_p8), %s417_s17, 4294967040  ;;  %p15_p9 = scmp.ge.s32.totalorder %s642_s24, 4   ;;  %s815_s18 = smov %s577_s19 }
 0x1cd   : > { %s816_s19 = smov %s581_s20  ;;  %s817_s20 = smov %s653_s27 }
 0x1ce   : > { %s818_s21 = smov %s642_s24  ;;  %17 = sbr.rel (!%p15_p9) target bundleno = 3 (0x3), region = 75 }
 0x1d3   :  { %423 = vsyncpa [#allocation3], 1 }
 0x1d4   :  { %425 = vsyncpa [#allocation3 + $0x1], 1 }

</bundles_post_ra>
